<compile_context>
chip_gen: v7x
topology: tpu7x:2x2x1
jax: 0.10.0
libtpu: 0.0.40
codegen_flags: <defaults>
</compile_context>

<pallas_src>
import math

import jax
import jax.numpy as jnp
from jax import lax
from jax.experimental import pallas as pl
from jax.experimental.pallas import tpu as pltpu

EPS = 1e-7
_LANE = 128
_SUBLANE = 8


def _round_up(x, m):
    return ((x + m - 1) // m) * m


def _listmle_block_kernel(y_true_ref, y_pred_ref, y_ours_ref, out_ref):
    """Sum of the ListMLE observation loss over one (TM, Np) row block."""
    yt = y_true_ref[...]
    yp = y_pred_ref[...]
    yo = y_ours_ref[...]

    tm, n = yt.shape
    neg_inf = jnp.float32(-jnp.inf)

    # mask = y_true_sorted == -1  (also true for all padded columns / rows)
    mask = yt == jnp.float32(-1.0)

    yp = jnp.where(mask, neg_inf, yp)
    yo = jnp.where(mask, neg_inf, yo)

    # Per-row max (dim=1, keepdim).  Guard fully-masked rows (e.g. batch
    # padding): max == -inf would give (-inf) - (-inf) = NaN downstream.
    max_p = jnp.max(yp, axis=1, keepdims=True)
    max_o = jnp.max(yo, axis=1, keepdims=True)
    max_p = jnp.where(max_p == neg_inf, jnp.float32(0.0), max_p)
    max_o = jnp.where(max_o == neg_inf, jnp.float32(0.0), max_o)

    pm = yp - max_p
    om = yo - max_o

    # revcumsum is linear, so revcumsum(exp(pm)) + revcumsum(exp(om)) ==
    # revcumsum(exp(pm) + exp(om)).  exp() at masked entries is exactly 0, so
    # padded columns contribute nothing.
    ev = jnp.exp(pm) + jnp.exp(om)

    # Reverse inclusive cumulative sum along the lane axis via a log2(N)-step
    # Hillis-Steele scan:  s[:, j] += s[:, j + d]  for d = 1, 2, 4, ...
    # pltpu.roll follows jnp.roll semantics, so roll(s, n-d)[:, j] = s[:, (j+d) % n];
    # the wrapped-around tail (j >= n - d) is masked to zero.
    col = lax.broadcasted_iota(jnp.int32, (tm, n), 1)
    s = ev
    d = 1
    while d < n:
        rolled = pltpu.roll(s, n - d, axis=1)
        s = s + jnp.where(col < (n - d), rolled, jnp.float32(0.0))
        d *= 2
    cumsums = s

    # observation_loss = log(cumsums + eps) - preds_sorted_by_true_minus_max
    obs = jnp.log(cumsums + jnp.float32(EPS)) - pm
    obs = jnp.where(mask, jnp.float32(0.0), obs)

    # Per-block partial sum, broadcast into a lane-dense (8, 128) store.
    total = jnp.sum(obs, keepdims=True)                      # (1, 1)
    out_ref[...] = total * jnp.ones(out_ref.shape, jnp.float32)


def listmle_with_our_samples(teacher_top1_sim_pred,
                             student_top1_sim_pred,
                             z1_z3_cos,
                             *,
                             gamma_,
                             perm_key,
                             row_block=128):
    """Functional equivalent of ListMLEWithOurSamples.forward."""
    y_pred = student_top1_sim_pred.astype(jnp.float32)
    y_true = teacher_top1_sim_pred.astype(jnp.float32)
    y_ours = z1_z3_cos.astype(jnp.float32)

    b, n = y_pred.shape
    # y_our_our_samples.diagonal().fill_(-inf)
    y_ours = jnp.where(jnp.eye(n, dtype=bool), -jnp.inf, y_ours)

    # TODO(synk): shuffle + sort + gather stay in plain JAX (no Pallas TPU
    #             sort / gather-along-axis primitive).
    random_indices = jax.random.permutation(perm_key, n)
    y_pred_sh = y_pred[:, random_indices]
    y_true_sh = y_true[:, random_indices]
    y_ours_sh = y_ours[:, random_indices]

    indices = jnp.argsort(-y_true_sh, axis=-1)
    y_true_sorted = jnp.take_along_axis(y_true_sh, indices, axis=1)
    preds_sorted = jnp.take_along_axis(y_pred_sh, indices, axis=1)
    ours_sorted = jnp.take_along_axis(y_ours_sh, indices, axis=1)

    # --- Pad for lane density / row tiling -------------------------------
    # Candidate axis -> multiple of 128 lanes.  Teacher pad = -1 so padded
    # columns hit the existing mask path (contribute exactly 0).  Row padding
    # (fully masked rows) also contributes 0 thanks to the in-kernel guard.
    n_pad = max(_LANE, _round_up(n, _LANE))
    tm = min(row_block, _round_up(b, _SUBLANE))   # modest TM keeps v5e's 16MiB scoped VMEM happy
    b_pad = _round_up(b, tm)
    pad_cols = n_pad - n
    pad_rows = b_pad - b
    y_true_p = jnp.pad(y_true_sorted, ((0, pad_rows), (0, pad_cols)), constant_values=-1.0)
    y_pred_p = jnp.pad(preds_sorted, ((0, pad_rows), (0, pad_cols)), constant_values=0.0)
    y_ours_p = jnp.pad(ours_sorted, ((0, pad_rows), (0, pad_cols)), constant_values=0.0)

    num_blocks = b_pad // tm
    steps = max(1, int(math.ceil(math.log2(n_pad))))
    cost = pl.CostEstimate(
        flops=int(b_pad * n_pad * (10 + 3 * steps)),
        transcendentals=int(3 * b_pad * n_pad),          # 2x exp + 1x log per element
        bytes_accessed=int(4 * (3 * b_pad * n_pad + num_blocks * _SUBLANE * _LANE)),
    )

    partials = pl.pallas_call(
        _listmle_block_kernel,
        out_shape=jax.ShapeDtypeStruct((num_blocks * _SUBLANE, _LANE), jnp.float32),
        grid=(num_blocks,),
        in_specs=[
            pl.BlockSpec((tm, n_pad), lambda i: (i, 0)),
            pl.BlockSpec((tm, n_pad), lambda i: (i, 0)),
            pl.BlockSpec((tm, n_pad), lambda i: (i, 0)),
        ],
        out_specs=pl.BlockSpec((_SUBLANE, _LANE), lambda i: (i, 0)),
        compiler_params=pltpu.CompilerParams(dimension_semantics=("parallel",)),
        cost_estimate=cost,
    )(y_true_p, y_pred_p, y_ours_p)

    # Per-block partial sums -> scalar in the wrapper (keeps the grid axis
    # "parallel" so the row blocks can be split across TensorCores).
    block_sums = partials[::_SUBLANE, 0]
    return jnp.float32(gamma_) * jnp.sum(block_sums) / jnp.float32(b)


def _reference_loss(y_true_sorted, preds_sorted, ours_sorted, gamma_):
    """Pure-jnp reference of the post-sort math (mirrors the torch code)."""
    mask = y_true_sorted == -1.0
    yp = jnp.where(mask, -jnp.inf, preds_sorted)
    yo = jnp.where(mask, -jnp.inf, ours_sorted)
    pm = yp - jnp.max(yp, axis=1, keepdims=True)
    om = yo - jnp.max(yo, axis=1, keepdims=True)
    cp = jnp.flip(jnp.cumsum(jnp.flip(jnp.exp(pm), 1), axis=1), 1)
    co = jnp.flip(jnp.cumsum(jnp.flip(jnp.exp(om), 1), axis=1), 1)
    cum = cp + co
    obs = jnp.log(cum + EPS) - pm
    obs = jnp.where(mask, 0.0, obs)
    return gamma_ * jnp.mean(jnp.sum(obs, axis=1))


if __name__ == "__main__":
    # Module "parameters" (from __init__): tau is unused in forward, gamma_ scales the loss.
    TAU = 0.05       # unused by forward (kept for fidelity with __init__)
    GAMMA = 0.10

    B = N = 16  # z1_z3_cos must be square (diagonal fill)

    key = jax.random.PRNGKey(0)
    k_t, k_s, k_z, k_perm = jax.random.split(key, 4)

    teacher = jax.random.uniform(k_t, (B, N), jnp.float32, minval=-1.0, maxval=1.0)
    student = jax.random.uniform(k_s, (B, N), jnp.float32, minval=-1.0, maxval=1.0)
    z1_z3 = jax.random.uniform(k_z, (B, N), jnp.float32, minval=-1.0, maxval=1.0)
    # exercise the `y_true_sorted == -1` mask path on a couple of entries
    teacher = teacher.at[0, 3].set(-1.0).at[2, 7].set(-1.0)

    loss = listmle_with_our_samples(teacher, student, z1_z3,
                                    gamma_=GAMMA, perm_key=k_perm)
    loss = jax.block_until_ready(loss)

    # Cross-check against a pure-jnp reference of the same post-sort math.
    y_ours = jnp.where(jnp.eye(N, dtype=bool), -jnp.inf, z1_z3)
    ridx = jax.random.permutation(k_perm, N)
    yt_sh, yp_sh, yo_sh = teacher[:, ridx], student[:, ridx], y_ours[:, ridx]
    idx = jnp.argsort(-yt_sh, axis=-1)
    ref = _reference_loss(jnp.take_along_axis(yt_sh, idx, 1),
                          jnp.take_along_axis(yp_sh, idx, 1),
                          jnp.take_along_axis(yo_sh, idx, 1),
                          GAMMA)
    assert jnp.allclose(loss, ref, rtol=1e-5, atol=1e-5), (loss, ref)

    print("KERNEL_OK")
</pallas_src>

<mosaic_0001>
module attributes {stable_mosaic.version = 11 : i64} {
  func.func @_listmle_block_kernel(%arg0: i32, %arg1: memref<16x128xf32, #tpu.memory_space<vmem>>, %arg2: memref<16x128xf32, #tpu.memory_space<vmem>>, %arg3: memref<16x128xf32, #tpu.memory_space<vmem>>, %arg4: memref<8x128xf32, #tpu.memory_space<vmem>>) attributes {dimension_semantics = [#tpu.dimension_semantics<parallel>], iteration_bounds = array<i64: 1>, scalar_prefetch = 0 : i64, scratch_operands = 0 : i64, tpu.core_type = #tpu.core_type<tc>, window_params = [{transform_indices = @transform_0, window_bounds = array<i64: 16, 128>}, {transform_indices = @transform_1, window_bounds = array<i64: 16, 128>}, {transform_indices = @transform_2, window_bounds = array<i64: 16, 128>}, {transform_indices = @transform_3, window_bounds = array<i64: 8, 128>}]} {
    %c0 = arith.constant 0 : index
    %c0_0 = arith.constant 0 : index
    %0 = vector.load %arg1[%c0, %c0_0] : memref<16x128xf32, #tpu.memory_space<vmem>>, vector<16x128xf32>
    %c0_1 = arith.constant 0 : index
    %c0_2 = arith.constant 0 : index
    %1 = vector.load %arg2[%c0_1, %c0_2] : memref<16x128xf32, #tpu.memory_space<vmem>>, vector<16x128xf32>
    %c0_3 = arith.constant 0 : index
    %c0_4 = arith.constant 0 : index
    %2 = vector.load %arg3[%c0_3, %c0_4] : memref<16x128xf32, #tpu.memory_space<vmem>>, vector<16x128xf32>
    %cst = arith.constant -1.000000e+00 : f32
    %3 = vector.broadcast %cst : f32 to vector<16x128xf32>
    %4 = arith.cmpf oeq, %0, %3 : vector<16x128xf32>
    %cst_5 = arith.constant 0xFF800000 : f32
    %5 = vector.broadcast %cst_5 : f32 to vector<16x128xf32>
    %6 = arith.select %4, %5, %1 : vector<16x128xi1>, vector<16x128xf32>
    %cst_6 = arith.constant 0xFF800000 : f32
    %7 = vector.broadcast %cst_6 : f32 to vector<16x128xf32>
    %8 = arith.select %4, %7, %2 : vector<16x128xi1>, vector<16x128xf32>
    %cst_7 = arith.constant dense<0xFF800000> : vector<16xf32>
    %9 = vector.multi_reduction <maximumf>, %6, %cst_7 [1] : vector<16x128xf32> to vector<16xf32>
    %10 = vector.shape_cast %9 : vector<16xf32> to vector<16x1xf32>
    %cst_8 = arith.constant dense<0xFF800000> : vector<16xf32>
    %11 = vector.multi_reduction <maximumf>, %8, %cst_8 [1] : vector<16x128xf32> to vector<16xf32>
    %12 = vector.shape_cast %11 : vector<16xf32> to vector<16x1xf32>
    %cst_9 = arith.constant 0xFF800000 : f32
    %13 = vector.broadcast %cst_9 : f32 to vector<16x1xf32>
    %14 = arith.cmpf oeq, %10, %13 : vector<16x1xf32>
    %cst_10 = arith.constant 0.000000e+00 : f32
    %15 = vector.broadcast %cst_10 : f32 to vector<16x1xf32>
    %16 = arith.select %14, %15, %10 : vector<16x1xi1>, vector<16x1xf32>
    %cst_11 = arith.constant 0xFF800000 : f32
    %17 = vector.broadcast %cst_11 : f32 to vector<16x1xf32>
    %18 = arith.cmpf oeq, %12, %17 : vector<16x1xf32>
    %cst_12 = arith.constant 0.000000e+00 : f32
    %19 = vector.broadcast %cst_12 : f32 to vector<16x1xf32>
    %20 = arith.select %18, %19, %12 : vector<16x1xi1>, vector<16x1xf32>
    %21 = vector.broadcast %16 : vector<16x1xf32> to vector<16x128xf32>
    %22 = arith.subf %6, %21 : vector<16x128xf32>
    %23 = vector.broadcast %20 : vector<16x1xf32> to vector<16x128xf32>
    %24 = arith.subf %8, %23 : vector<16x128xf32>
    %25 = math.exp %22 : vector<16x128xf32>
    %26 = math.exp %24 : vector<16x128xf32>
    %27 = arith.addf %25, %26 : vector<16x128xf32>
    %28 = tpu.iota {dimensions = array<i32: 1>} : vector<16x128xi32>
    %c127_i32 = arith.constant 127 : i32
    %29 = tpu.dynamic_rotate %27 by %c127_i32 dim 1 : vector<16x128xf32>, i32 -> vector<16x128xf32>
    %c127_i32_13 = arith.constant 127 : i32
    %30 = vector.broadcast %c127_i32_13 : i32 to vector<16x128xi32>
    %31 = arith.cmpi slt, %28, %30 : vector<16x128xi32>
    %cst_14 = arith.constant 0.000000e+00 : f32
    %32 = vector.broadcast %cst_14 : f32 to vector<16x128xf32>
    %33 = arith.select %31, %29, %32 : vector<16x128xi1>, vector<16x128xf32>
    %34 = arith.addf %27, %33 : vector<16x128xf32>
    %c126_i32 = arith.constant 126 : i32
    %35 = tpu.dynamic_rotate %34 by %c126_i32 dim 1 : vector<16x128xf32>, i32 -> vector<16x128xf32>
    %c126_i32_15 = arith.constant 126 : i32
    %36 = vector.broadcast %c126_i32_15 : i32 to vector<16x128xi32>
    %37 = arith.cmpi slt, %28, %36 : vector<16x128xi32>
    %cst_16 = arith.constant 0.000000e+00 : f32
    %38 = vector.broadcast %cst_16 : f32 to vector<16x128xf32>
    %39 = arith.select %37, %35, %38 : vector<16x128xi1>, vector<16x128xf32>
    %40 = arith.addf %34, %39 : vector<16x128xf32>
    %c124_i32 = arith.constant 124 : i32
    %41 = tpu.dynamic_rotate %40 by %c124_i32 dim 1 : vector<16x128xf32>, i32 -> vector<16x128xf32>
    %c124_i32_17 = arith.constant 124 : i32
    %42 = vector.broadcast %c124_i32_17 : i32 to vector<16x128xi32>
    %43 = arith.cmpi slt, %28, %42 : vector<16x128xi32>
    %cst_18 = arith.constant 0.000000e+00 : f32
    %44 = vector.broadcast %cst_18 : f32 to vector<16x128xf32>
    %45 = arith.select %43, %41, %44 : vector<16x128xi1>, vector<16x128xf32>
    %46 = arith.addf %40, %45 : vector<16x128xf32>
    %c120_i32 = arith.constant 120 : i32
    %47 = tpu.dynamic_rotate %46 by %c120_i32 dim 1 : vector<16x128xf32>, i32 -> vector<16x128xf32>
    %c120_i32_19 = arith.constant 120 : i32
    %48 = vector.broadcast %c120_i32_19 : i32 to vector<16x128xi32>
    %49 = arith.cmpi slt, %28, %48 : vector<16x128xi32>
    %cst_20 = arith.constant 0.000000e+00 : f32
    %50 = vector.broadcast %cst_20 : f32 to vector<16x128xf32>
    %51 = arith.select %49, %47, %50 : vector<16x128xi1>, vector<16x128xf32>
    %52 = arith.addf %46, %51 : vector<16x128xf32>
    %c112_i32 = arith.constant 112 : i32
    %53 = tpu.dynamic_rotate %52 by %c112_i32 dim 1 : vector<16x128xf32>, i32 -> vector<16x128xf32>
    %c112_i32_21 = arith.constant 112 : i32
    %54 = vector.broadcast %c112_i32_21 : i32 to vector<16x128xi32>
    %55 = arith.cmpi slt, %28, %54 : vector<16x128xi32>
    %cst_22 = arith.constant 0.000000e+00 : f32
    %56 = vector.broadcast %cst_22 : f32 to vector<16x128xf32>
    %57 = arith.select %55, %53, %56 : vector<16x128xi1>, vector<16x128xf32>
    %58 = arith.addf %52, %57 : vector<16x128xf32>
    %c96_i32 = arith.constant 96 : i32
    %59 = tpu.dynamic_rotate %58 by %c96_i32 dim 1 : vector<16x128xf32>, i32 -> vector<16x128xf32>
    %c96_i32_23 = arith.constant 96 : i32
    %60 = vector.broadcast %c96_i32_23 : i32 to vector<16x128xi32>
    %61 = arith.cmpi slt, %28, %60 : vector<16x128xi32>
    %cst_24 = arith.constant 0.000000e+00 : f32
    %62 = vector.broadcast %cst_24 : f32 to vector<16x128xf32>
    %63 = arith.select %61, %59, %62 : vector<16x128xi1>, vector<16x128xf32>
    %64 = arith.addf %58, %63 : vector<16x128xf32>
    %c64_i32 = arith.constant 64 : i32
    %65 = tpu.dynamic_rotate %64 by %c64_i32 dim 1 : vector<16x128xf32>, i32 -> vector<16x128xf32>
    %c64_i32_25 = arith.constant 64 : i32
    %66 = vector.broadcast %c64_i32_25 : i32 to vector<16x128xi32>
    %67 = arith.cmpi slt, %28, %66 : vector<16x128xi32>
    %cst_26 = arith.constant 0.000000e+00 : f32
    %68 = vector.broadcast %cst_26 : f32 to vector<16x128xf32>
    %69 = arith.select %67, %65, %68 : vector<16x128xi1>, vector<16x128xf32>
    %70 = arith.addf %64, %69 : vector<16x128xf32>
    %cst_27 = arith.constant 1.000000e-07 : f32
    %71 = vector.broadcast %cst_27 : f32 to vector<16x128xf32>
    %72 = arith.addf %70, %71 : vector<16x128xf32>
    %73 = math.log %72 : vector<16x128xf32>
    %74 = arith.subf %73, %22 : vector<16x128xf32>
    %cst_28 = arith.constant 0.000000e+00 : f32
    %75 = vector.broadcast %cst_28 : f32 to vector<16x128xf32>
    %76 = arith.select %4, %75, %74 : vector<16x128xi1>, vector<16x128xf32>
    %77 = vector.shape_cast %76 : vector<16x128xf32> to vector<1x16x128xf32>
    %cst_29 = arith.constant dense<0.000000e+00> : vector<1xf32>
    %78 = vector.multi_reduction <add>, %77, %cst_29 [1, 2] : vector<1x16x128xf32> to vector<1xf32>
    %79 = vector.shape_cast %78 : vector<1xf32> to vector<1x1x1xf32>
    %80 = vector.extract %79[0, 0, 0] : f32 from vector<1x1x1xf32>
    %81 = vector.broadcast %80 : f32 to vector<1x1xf32>
    %cst_30 = arith.constant 1.000000e+00 : f32
    %82 = vector.broadcast %cst_30 : f32 to vector<8x128xf32>
    %83 = vector.broadcast %81 : vector<1x1xf32> to vector<8x128xf32>
    %84 = arith.mulf %83, %82 : vector<8x128xf32>
    %c0_31 = arith.constant 0 : index
    %c0_32 = arith.constant 0 : index
    %85 = vector.load %arg4[%c0_31, %c0_32] : memref<8x128xf32, #tpu.memory_space<vmem>>, vector<8x128xf32>
    tpu.vector_store %arg4[%c0_31, %c0_32], %84 {strides = array<i32>} : memref<8x128xf32, #tpu.memory_space<vmem>>, vector<8x128xf32>,
    return
  }
  func.func @transform_0(%arg0: i32) -> (i32, i32) {
    %c0_i32 = arith.constant 0 : i32
    %c0_i32_0 = arith.constant 0 : i32
    return %arg0, %c0_i32 : i32, i32
  }
  func.func @transform_1(%arg0: i32) -> (i32, i32) {
    %c0_i32 = arith.constant 0 : i32
    %c0_i32_0 = arith.constant 0 : i32
    return %arg0, %c0_i32 : i32, i32
  }
  func.func @transform_2(%arg0: i32) -> (i32, i32) {
    %c0_i32 = arith.constant 0 : i32
    %c0_i32_0 = arith.constant 0 : i32
    return %arg0, %c0_i32 : i32, i32
  }
  func.func @transform_3(%arg0: i32) -> (i32, i32) {
    %c0_i32 = arith.constant 0 : i32
    %c0_i32_0 = arith.constant 0 : i32
    return %arg0, %c0_i32 : i32, i32
  }
}

</mosaic_0001>

<bundles_post_ra>
// kernel: tpu_custom_call.1
= control target key start
LH: loop header
LB: loop body
LE: loop exit
PB: predicated region body
PF: predicated region fallthrough
CT: control target
= control target key end

     0   :  { %8 = vsyncpa [#allocation3], 0  ;;  %s454_s0 = inlined_call_operand.hbm [shape: f32[16,128], index: 0, kind: input, shape index: {}]   ;;  %s455_s1 = inlined_call_operand.hbm [shape: f32[16,128], index: 1, kind: input, shape index: {}]   ;;  %s456_s2 = inlined_call_operand.hbm [shape: f32[16,128], index: 2, kind: input, shape index: {}]   ;;  %s457_s3 = inlined_call_operand.hbm [shape: f32[8,128], index: 3, kind: output, shape index: {}]  }
   0x1   :  { %9 = vsyncpa [#allocation6], 0 }
   0x2   :  { %10 = vsyncpa [#allocation4], 0  ;;  %s322_s12 = smov [#allocation5]   ;;  %s323_s14 = smov [#allocation2]  }
   0x3   :  { %s28_s13 = sshll.u32 %s322_s12, 4  ;;  %s16_s15 = sshll.u32 %s323_s14, 4  ;;  %s29_s13 = int_to_ptr.vmem [resolvable:$true] %s28_s13  ;;  %s355_s15 = int_to_ptr.vmem [resolvable:$true] %s16_s15 }
   0x4   :  { %s228_s18 = scalar_lea.hbm %s455_s1, 256 }
   0x5   :  { %p229_p0 = scmp.ne.s32.totalorder %s455_s1, %s228_s18  ;;  %p232_p1 = scmp.lt.u32.totalorder %s228_s18, %s455_s1 }
   0x7   :  { %p234_p2 = pnand %p232_p1, %p229_p0 }
   0x9   :  { %237 = shalt.err (!%p234_p2)
}
   0xa   :  { %s238_s23 = scalar_lea.vmem %s29_s13, 256  ;;  %p243_p4 = scmp.lt.s32.totalorder %s29_s13, %s29_s13 }
   0xb   :  { %p239_p3 = scmp.ne.s32.totalorder %s29_s13, %s238_s23  ;;  %p244_p5 = scmp.lt.s32.totalorder %s238_s23, %s238_s23 }
   0xd   :  { %p245_p6 = por %p244_p5, %p243_p4 }
   0xf   :  { %p246_p7 = pnand %p245_p6, %p239_p3 }
  0x11   :  { %249 = shalt.err (!%p246_p7)
}
  0x12   :  { %s324_s24 = smov 128   ;;  %s325_s25 = smov 8  }
  0x13   :  { %34 = dma.hbm_to_vmem [thread:$0]  %s455_s1, 256, %s29_s13, [#allocation6], %s324_s24, %s324_s24, %s325_s25  }
  0x14   :  { %s250_s30 = scalar_lea.hbm %s454_s0, 256 }
  0x15   :  { %p251_p8 = scmp.ne.s32.totalorder %s454_s0, %s250_s30  ;;  %p254_p9 = scmp.lt.u32.totalorder %s250_s30, %s454_s0 }
  0x17   :  { %p256_p10 = pnand %p254_p9, %p251_p8 }
  0x19   :  { %259 = shalt.err (!%p256_p10)
}
  0x1a   :  { %s260_s8 = scalar_lea.vmem %s355_s15, 256  ;;  %p265_p12 = scmp.lt.s32.totalorder %s355_s15, %s355_s15 }
  0x1b   :  { %p261_p11 = scmp.ne.s32.totalorder %s355_s15, %s260_s8  ;;  %p266_p13 = scmp.lt.s32.totalorder %s260_s8, %s260_s8 }
  0x1d   :  { %p267_p0 = por %p266_p13, %p265_p12 }
  0x1f   :  { %p268_p1 = pnand %p267_p0, %p261_p11 }
  0x21   :  { %271 = shalt.err (!%p268_p1)
}
  0x22   :  { %22 = dma.hbm_to_vmem [thread:$0]  %s454_s0, 256, %s355_s15, [#allocation3], %s324_s24, %s324_s24, %s325_s25  }
  0x23   :  { %s326_s10 = smov [#allocation7]   ;;  %s272_s14 = scalar_lea.hbm %s456_s2, 256 }
  0x24   :  { %s40_s11 = sshll.u32 %s326_s10, 4  ;;  %p273_p2 = scmp.ne.s32.totalorder %s456_s2, %s272_s14  ;;  %s41_s11 = int_to_ptr.vmem [resolvable:$true] %s40_s11 }
  0x25   :  { %p276_p3 = scmp.lt.u32.totalorder %s272_s14, %s456_s2 }
  0x27   :  { %p278_p4 = pnand %p276_p3, %p273_p2 }
  0x29   :  { %281 = shalt.err (!%p278_p4)
}
  0x2a   :  { %s282_s20 = scalar_lea.vmem %s41_s11, 256  ;;  %p287_p6 = scmp.lt.s32.totalorder %s41_s11, %s41_s11 }
  0x2b   :  { %p283_p5 = scmp.ne.s32.totalorder %s41_s11, %s282_s20  ;;  %p288_p7 = scmp.lt.s32.totalorder %s282_s20, %s282_s20 }
  0x2d   :  { %p289_p8 = por %p288_p7, %p287_p6 }
  0x2f   :  { %p290_p9 = pnand %p289_p8, %p283_p5 }
  0x31   :  { %293 = shalt.err (!%p290_p9)
}
  0x32   :  { %46 = dma.hbm_to_vmem [thread:$0]  %s456_s2, 256, %s41_s11, [#allocation6], %s324_s24, %s324_s24, %s325_s25  }
  0x33   :  { %316 = dma.done.wait [#allocation3], 256  }
  0x34   :  { %317 = vsyncadd [#allocation3], 4294967040 }
  0x35   :  { %318 = dma.done.wait [#allocation6], 512  }
  0x36   :  { %319 = vsyncadd [#allocation6], 4294966784  ;;  %v407_v0 = vld [vmem:[#allocation2] sm:$0xff]  ;;  %v58_v2 = vld [vmem:[#allocation5] sm:$0xff]  ;;  %s327_s2 = smov 127   ;;  %v98_v32 = vlaneseq  ;;  %s328_s21 = smov 126  }
  0x37   :  { %v60_v1 = vld [vmem:[#allocation7] sm:$0xff]  ;;  %vm62_vm0 = vcmp.eq.f32.partialorder %v407_v0, -1.0  ;;  %v410_v3 = vld [vmem:[#allocation2 + $0x8] sm:$0xff]  ;;  %v59_v5 = vld [vmem:[#allocation5 + $0x8] sm:$0xff]  ;;  %s329_s22 = smov 124   ;;  %s330_s23 = smov 120  }
  0x38   :  { %v61_v4 = vld [vmem:[#allocation7 + $0x8] sm:$0xff]  ;;  %v66_v6 = vsel %vm62_vm0, -inf, %v60_v1  ;;  %v64_v7 = vsel %vm62_vm0, -inf, %v58_v2  ;;  %vm63_vm1 = vcmp.eq.f32.partialorder %v410_v3, -1.0  ;;  %v427_v33 = vand.u32 127, %v98_v32  ;;  %s331_s24 = smov 112  }
  0x39   :  { %72 = vmax.xlane.f32.xlu1 %v66_v6  ;;  %68 = vmax.xlane.f32.xlu0 %v64_v7  ;;  %v67_v8 = vsel %vm63_vm1, -inf, %v61_v4  ;;  %v65_v9 = vsel %vm63_vm1, -inf, %v59_v5  ;;  %s332_s25 = smov 96   ;;  %s333_s26 = smov 64  }
  0x3a   :  { %vm104_vm6 = vcmp.lt.s32.totalorder %v427_v33, 127  ;;  %vm113_vm7 = vcmp.lt.s32.totalorder %v427_v33, 126  ;;  %vm122_vm8 = vcmp.lt.s32.totalorder %v427_v33, 124  ;;  %vm131_vm9 = vcmp.lt.s32.totalorder %v427_v33, 120  ;;  %s334_s27 = smov [#allocation8]  }
  0x3b   :  { %vm140_vm10 = vcmp.lt.s32.totalorder %v427_v33, 112  ;;  %vm149_vm11 = vcmp.lt.s32.totalorder %v427_v33, 96  ;;  %vm158_vm12 = vcmp.lt.s32.totalorder %v427_v33, 64  ;;  %s191_s28 = sshll.u32 %s334_s27, 4  ;;  %s192_s28 = int_to_ptr.vmem [resolvable:$true] %s191_s28 }
  0x3c   :  { %s294_s30 = scalar_lea.vmem %s192_s28, 128  ;;  %p299_p11 = scmp.lt.s32.totalorder %s192_s28, %s192_s28 }
  0x3d   :  { %74 = vmax.xlane.f32.xlu1 %v67_v8  ;;  %70 = vmax.xlane.f32.xlu0 %v65_v9  ;;  %p295_p10 = scmp.ne.s32.totalorder %s192_s28, %s294_s30  ;;  %p300_p12 = scmp.lt.s32.totalorder %s294_s30, %s294_s30 }
  0x3f   :  { %p301_p13 = por %p300_p12, %p299_p11 }
  0x41   :  { %p302_p0 = pnand %p301_p13, %p295_p10 }
  0xc6   :  { %v73_v10 = vpop.xlane.xlu1 %72  ;;  %v69_v11 = vpop.xlane.xlu0 %68 }
  0xc7   :  { %vm80_vm2 = vcmp.eq.f32.partialorder %v73_v10, -inf  ;;  %vm76_vm3 = vcmp.eq.f32.partialorder %v69_v11, -inf }
  0xc8   :  { %v82_v12 = vsel %vm80_vm2, 0.0, %v73_v10  ;;  %v78_v13 = vsel %vm76_vm3, 0.0, %v69_v11 }
  0xc9   :  { %v86_v14 = vsub.f32 %v66_v6, %v82_v12  ;;  %v421_v15 = vsub.f32 %v64_v7, %v78_v13 }
  0xca   :  { %v75_v16 = vpop.xlane.xlu1 %74  ;;  %v71_v17 = vpop.xlane.xlu0 %70 }
  0xcb   :  { %v92_v18 = vmul.f32 1.442695, %v86_v14  ;;  %v88_v19 = vmul.f32 1.442695, %v421_v15  ;;  %vm81_vm4 = vcmp.eq.f32.partialorder %v75_v16, -inf  ;;  %vm77_vm5 = vcmp.eq.f32.partialorder %v71_v17, -inf }
  0xcc   :  { %v83_v20 = vsel %vm81_vm4, 0.0, %v75_v16  ;;  %v79_v21 = vsel %vm77_vm5, 0.0, %v71_v17 }
  0xcd   :  { %216 = vpow2.f32 %v92_v18  ;;  %v87_v22 = vsub.f32 %v67_v8, %v83_v20  ;;  %v424_v23 = vsub.f32 %v65_v9, %v79_v21 }
  0xce   :  { %218 = vpow2.f32 %v88_v19 }
  0xcf   :  { %v94_v24 = vmul.f32 1.442695, %v87_v22  ;;  %v90_v25 = vmul.f32 1.442695, %v424_v23 }
  0xd1   :  { %220 = vpow2.f32 %v94_v24 }
  0xd2   :  { %222 = vpow2.f32 %v90_v25 }
  0xd7   :  { %v217_v26 = vpop.eup %216 }
  0xd8   :  { %v219_v27 = vpop.eup %218 }
  0xd9   :  { %v96_v28 = vadd.f32 %v219_v27, %v217_v26 }
  0xdb   :  { %v221_v29 = vpop.eup %220  ;;  %100 = vrot.lane.b32.xlu0 %v96_v28, %s327_s2 }
  0xdc   :  { %v223_v30 = vpop.eup %222 }
  0xdd   :  { %v97_v31 = vadd.f32 %v223_v30, %v221_v29 }
  0xdf   :  { %102 = vrot.lane.b32.xlu1 %v97_v31, %s327_s2 }
 0x14d   :  { %v101_v34 = vpop.permute.xlu0 %100 }
 0x14e   :  { %v105_v35 = vsel %vm104_vm6, %v101_v34, 0.0 }
 0x14f   :  { %v107_v36 = vadd.f32 %v105_v35, %v96_v28 }
 0x151   :  { %v103_v37 = vpop.permute.xlu1 %102  ;;  %109 = vrot.lane.b32.xlu1 %v107_v36, %s328_s21 }
 0x152   :  { %v106_v38 = vsel %vm104_vm6, %v103_v37, 0.0 }
 0x153   :  { %v108_v39 = vadd.f32 %v106_v38, %v97_v31 }
 0x155   :  { %111 = vrot.lane.b32.xlu1 %v108_v39, %s328_s21 }
 0x1c3   :  { %v110_v40 = vpop.permute.xlu1 %109 }
 0x1c4   :  { %v114_v41 = vsel %vm113_vm7, %v110_v40, 0.0 }
 0x1c5   :  { %v116_v42 = vadd.f32 %v114_v41, %v107_v36 }
 0x1c7   :  { %118 = vrot.lane.b32.xlu0 %v116_v42, %s329_s22  ;;  %v112_v43 = vpop.permute.xlu1 %111 }
 0x1c8   :  { %v115_v44 = vsel %vm113_vm7, %v112_v43, 0.0 }
 0x1c9   :  { %v117_v45 = vadd.f32 %v115_v44, %v108_v39 }
 0x1cb   :  { %120 = vrot.lane.b32.xlu1 %v117_v45, %s329_s22 }
 0x239   :  { %v119_v46 = vpop.permute.xlu0 %118 }
 0x23a   :  { %v123_v47 = vsel %vm122_vm8, %v119_v46, 0.0 }
 0x23b   :  { %v125_v48 = vadd.f32 %v123_v47, %v116_v42 }
 0x23d   :  { %127 = vrot.lane.b32.xlu0 %v125_v48, %s330_s23  ;;  %v121_v49 = vpop.permute.xlu1 %120 }
 0x23e   :  { %v124_v50 = vsel %vm122_vm8, %v121_v49, 0.0 }
 0x23f   :  { %v126_v51 = vadd.f32 %v124_v50, %v117_v45 }
 0x241   :  { %129 = vrot.lane.b32.xlu1 %v126_v51, %s330_s23 }
 0x2af   :  { %v128_v52 = vpop.permute.xlu0 %127 }
 0x2b0   :  { %v132_v53 = vsel %vm131_vm9, %v128_v52, 0.0 }
 0x2b1   :  { %v134_v54 = vadd.f32 %v132_v53, %v125_v48 }
 0x2b3   :  { %136 = vrot.lane.b32.xlu0 %v134_v54, %s331_s24  ;;  %v130_v55 = vpop.permute.xlu1 %129 }
 0x2b4   :  { %v133_v56 = vsel %vm131_vm9, %v130_v55, 0.0 }
 0x2b5   :  { %v135_v57 = vadd.f32 %v133_v56, %v126_v51 }
 0x2b7   :  { %138 = vrot.lane.b32.xlu1 %v135_v57, %s331_s24 }
 0x325   :  { %v137_v58 = vpop.permute.xlu0 %136 }
 0x326   :  { %v141_v59 = vsel %vm140_vm10, %v137_v58, 0.0 }
 0x327   :  { %v143_v60 = vadd.f32 %v141_v59, %v134_v54 }
 0x329   :  { %145 = vrot.lane.b32.xlu0 %v143_v60, %s332_s25  ;;  %v139_v61 = vpop.permute.xlu1 %138 }
 0x32a   :  { %v142_v62 = vsel %vm140_vm10, %v139_v61, 0.0 }
 0x32b   :  { %v144_v63 = vadd.f32 %v142_v62, %v135_v57 }
 0x32d   :  { %147 = vrot.lane.b32.xlu1 %v144_v63, %s332_s25 }
 0x39b   :  { %v146_v1 = vpop.permute.xlu0 %145 }
 0x39c   :  { %v150_v2 = vsel %vm149_vm11, %v146_v1, 0.0 }
 0x39d   :  { %v152_v4 = vadd.f32 %v150_v2, %v143_v60 }
 0x39f   :  { %154 = vrot.lane.b32.xlu0 %v152_v4, %s333_s26  ;;  %v148_v5 = vpop.permute.xlu1 %147 }
 0x3a0   :  { %v151_v6 = vsel %vm149_vm11, %v148_v5, 0.0 }
 0x3a1   :  { %v153_v7 = vadd.f32 %v151_v6, %v144_v63 }
 0x3a3   :  { %156 = vrot.lane.b32.xlu1 %v153_v7, %s333_s26 }
 0x411   :  { %v155_v8 = vpop.permute.xlu0 %154 }
 0x412   :  { %v159_v9 = vsel %vm158_vm12, %v155_v8, 0.0 }
 0x413   :  { %v161_v10 = vadd.f32 %v159_v9, %v152_v4 }
 0x415   :  { %v163_v11 = vadd.f32 1e-07, %v161_v10  ;;  %v157_v12 = vpop.permute.xlu1 %156 }
 0x416   :  { %v160_v13 = vsel %vm158_vm12, %v157_v12, 0.0 }
 0x417   :  { %224 = vlog2.f32 %v163_v11  ;;  %v162_v14 = vadd.f32 %v160_v13, %v153_v7 }
 0x419   :  { %v164_v16 = vadd.f32 1e-07, %v162_v14 }
 0x41b   :  { %226 = vlog2.f32 %v164_v16 }
 0x421   :  { %v225_v17 = vpop.eup %224 }
 0x422   :  { %v166_v18 = vmul.f32 0.6931472, %v225_v17 }
 0x424   :  { %v169_v21 = vsub.f32 %v166_v18, %v421_v15 }
 0x425   :  { %v227_v19 = vpop.eup %226 }
 0x426   :  { %v168_v20 = vmul.f32 0.6931472, %v227_v19  ;;  %v171_v24 = vsel %vm62_vm0, 0.0, %v169_v21 }
 0x428   :  { %v170_v22 = vsub.f32 %v168_v20, %v424_v23 }
 0x42a   :  { %v172_v25 = vsel %vm63_vm1, 0.0, %v170_v22 }
 0x42b   :  { %v173_v26 = vadd.f32 %v172_v25, %v171_v24 }
 0x42d   :  { %174 = vadd.xlane.f32.xlu0 %v173_v26 }
 0x4ba   :  { %v175_v27 = vpop.xlane.xlu0 %174 }
 0x4bb   :  { %v176_v28 = vrot.slane %v175_v27, 4 }
 0x4bd   :  { %v177_v29 = vadd.f32 %v176_v28, %v175_v27 }
 0x4bf   :  { %v178_v30 = vrot.slane %v177_v29, 2 }
 0x4c1   :  { %v179_v31 = vadd.f32 %v178_v30, %v177_v29 }
 0x4c3   :  { %v180_v32 = vrot.slane %v179_v31, 1 }
 0x4c5   :  { %v181_v33 = vadd.f32 %v180_v32, %v179_v31 }
 0x4c7   :  { %201 = vpush %v181_v33 }
 0x4f8   :  { %s202_s29 = spop %201 }
 0x4f9   :  { %v183_v15 = vstv %s202_s29 }
 0x4fa   :  { %184 = vst [vmem:[#allocation8] sm:$0xff] %v183_v15 }
 0x4fb   :  { %305 = shalt.err (!%p302_p0)
}
 0x4fc   :  { %s306_s6 = scalar_lea.hbm %s457_s3, 128 }
 0x4fd   :  { %p307_p1 = scmp.ne.s32.totalorder %s457_s3, %s306_s6  ;;  %p310_p2 = scmp.lt.u32.totalorder %s306_s6, %s457_s3 }
 0x4ff   :  { %p312_p3 = pnand %p310_p2, %p307_p1 }
 0x501   :  { %315 = shalt.err (!%p312_p3)
}
 0x502   :  { %194 = dma.vmem_to_hbm [thread:$0]  %s192_s28, 128, %s457_s3, [#allocation4]  }
 0x503   :  { %320 = dma.done.wait [#allocation4], 128  }
 0x504   :  { %321 = vsyncadd [#allocation4], 4294967168 }
 0x505   :  { %198 = vsyncpa [#allocation3], 1 }
 0x506   :  { %199 = vsyncpa [#allocation6], 1 }
 0x507   :  { %200 = vsyncpa [#allocation4], 1 }

</bundles_post_ra>
